<compile_context>
chip_gen: v5e
topology: v5e:2x2
jax: 0.10.0
libtpu: 0.0.40
codegen_flags: <defaults>
</compile_context>

<pallas_src>
import jax
import jax.numpy as jnp
from jax.experimental import pallas as pl
from jax.experimental.pallas import tpu as pltpu


def _self_attention_kernel(x_ref, w_ref, p_ref, o_ref):
    tb, s, d = x_ref.shape          # d = lane-padded feature dim (multiple of 128)
    h = w_ref.shape[1]

    x = x_ref[...]                                   # (TB, S, Dp), input dtype
    w = w_ref[...]                                   # (Dp, H)
    proj_row = p_ref[...].astype(jnp.float32)        # (1, H), lane-major

    # ---- u = tanh(x @ W) ------------------------------------------------------
    # At small D the binding unit is the EUP (TB*S*H tanhs), not the MXU, so the
    # matmul only needs a sane layout, not a tuned one.
    if s % 8 == 0:
        # Collapsing (TB,S) is a free relayout only when S is a sublane multiple.
        u = jnp.dot(x.reshape(tb * s, d), w,
                    preferred_element_type=jnp.float32).reshape(tb, s, h)
    else:
        # TODO(synk): this path keeps the batched contraction (no collapse) to
        # avoid a hidden VMEM copy when S is not a multiple of 8.
        u = jnp.einsum("bsd,dh->bsh", x, w, preferred_element_type=jnp.float32)
    u = jnp.tanh(u)                                  # (TB, S, H) f32, EUP-bound

    # ---- att = u @ proj as a lane reduction over H (keeps the MXU free) -------
    att = jnp.sum(u * proj_row, axis=-1)             # (TB, S), S on the lane axis

    # ---- softmax over the sequence axis (lane axis), exact f32 math -----------
    att = att - jnp.max(att, axis=-1, keepdims=True)
    e = jnp.exp(att)
    score = e / jnp.sum(e, axis=-1, keepdims=True)   # exact divide (accuracy fix)

    # ---- out = sum_S(score * x): VPU multiply + sublane reduce, f32 accum -----
    # (M=1 per-batch MXU matmuls waste 127/255 of the MXU rows; with small S the
    #  sublane reduce is one cheap XLU op per vreg.)
    out = jnp.sum(x.astype(jnp.float32) * score[:, :, None], axis=1)   # (TB, Dp)
    o_ref[...] = out.astype(o_ref.dtype)


def _tpu_generation_info():
    """Return (vmem_capacity_bytes, num_tensorcores, is_v7x) with safe fallbacks."""
    try:
        kind = jax.devices()[0].device_kind.lower()
    except Exception:
        kind = ""
    is_v7x = ("v7" in kind) or ("7x" in kind)
    try:
        vmem_cap = int(pltpu.get_tpu_info().vmem_capacity_bytes)
    except Exception:
        vmem_cap = (64 << 20) if is_v7x else (128 << 20)
    num_tc = 2 if is_v7x else 1
    return vmem_cap, num_tc, is_v7x


def _choose_batch_tile(B, S, Dp, H, vmem_budget, num_cores):
    """Generation-aware batch tile.

    Single-TC (v5e/v6e): maximize TB (grid=1 if it fits) -- the grid is a
    serial loop, every extra step costs ~0.35 us.  v7x (2 TCs): prefer >= 2
    grid steps so both cores get work.  TB must be a multiple of 8 (or == B)
    so the (TB, Dp) output block satisfies the (8,128) tiling rule.
    """

    def vmem_bytes(tb):
        x_tile = 2 * tb * S * Dp * 4          # double-buffered input block (f32 worst case)
        o_tile = 2 * tb * Dp * 4              # double-buffered output block
        wts = 2 * (Dp * H + H) * 4            # resident weights
        inter = tb * S * (H + Dp + 8) * 4     # f32 intermediates (u, score, out, ...)
        return x_tile + o_tile + wts + inter

    candidates = [
        t for t in range(1, B + 1)
        if B % t == 0 and (t == B or t % 8 == 0) and vmem_bytes(t) <= vmem_budget
    ]
    if not candidates:
        return B
    if num_cores >= 2:
        multi = [t for t in candidates if B // t >= num_cores]
        if multi:
            return max(multi)
    return max(candidates)


def self_attention(x, weight_W, weight_proj, *, batch_tile=None):
    """x: (B, S, D); weight_W: (D, H); weight_proj: (H, 1) -> (B, D)."""
    B, S, D = x.shape
    H = weight_W.shape[1]
    assert weight_W.shape == (D, H)
    assert weight_proj.shape == (H, 1)

    # ---- lane-dense output: pad the feature dim up to a multiple of 128 -------
    Dp = max(128, ((D + 127) // 128) * 128)
    if Dp != D:
        x_p = jnp.pad(x, ((0, 0), (0, 0), (0, Dp - D)))
        w_p = jnp.pad(weight_W, ((0, Dp - D), (0, 0)))
    else:
        x_p, w_p = x, weight_W
    proj_row = weight_proj.T                      # (1, H), one host-side transpose

    # ---- generation-aware VMEM budget + batch tile -----------------------------
    vmem_cap, num_tc, is_v7x = _tpu_generation_info()
    vmem_budget = min(100 << 20, (vmem_cap * 3) // 4)        # ~96 MiB v5e/v6e, ~48 MiB v7x
    vmem_limit = int(min(vmem_cap - (8 << 20), vmem_budget + (16 << 20)))

    TB = batch_tile if batch_tile is not None else _choose_batch_tile(
        B, S, Dp, H, vmem_budget, num_tc)
    assert B % TB == 0, f"batch tile {TB} must divide batch {B}"

    # W never changes across grid steps; on v7x (64 MiB VMEM) don't double-buffer it.
    if is_v7x:
        w_spec = pl.BlockSpec((Dp, H), lambda b: (0, 0), pipeline_mode=pl.Buffered(1))
    else:
        w_spec = pl.BlockSpec((Dp, H), lambda b: (0, 0))

    out_padded = pl.pallas_call(
        _self_attention_kernel,
        out_shape=jax.ShapeDtypeStruct((B, Dp), x.dtype),
        grid_spec=pltpu.PrefetchScalarGridSpec(
            num_scalar_prefetch=0,
            grid=(B // TB,),
            in_specs=[
                pl.BlockSpec((TB, S, Dp), lambda b: (b, 0, 0)),  # TB batches / step
                w_spec,                                          # full W (resident)
                pl.BlockSpec((1, H), lambda b: (0, 0)),          # proj row (resident)
            ],
            out_specs=pl.BlockSpec((TB, Dp), lambda b: (b, 0)),  # lane-dense output
        ),
        compiler_params=pltpu.CompilerParams(
            dimension_semantics=("parallel",),
            vmem_limit_bytes=vmem_limit,
        ),
    )(x_p, w_p, proj_row)

    return out_padded[:, :D]


def self_attention_ref(x, weight_W, weight_proj):
    """Pure-JAX reference mirroring the PyTorch forward."""
    u = jnp.tanh(jnp.matmul(x, weight_W))               # (B, S, H)
    att = jnp.matmul(u, weight_proj)                    # (B, S, 1)
    att_score = jax.nn.softmax(att, axis=1)             # softmax over seq dim
    scored_x = x * att_score
    return jnp.sum(scored_x, axis=1)                    # (B, D)


if __name__ == "__main__":
    # batch, seq, input_size, hidden_size (small, but big enough to exercise
    # the batch-tiled grid and the D -> 128 lane padding).
    B, S, D, H = 16, 8, 16, 32

    key = jax.random.PRNGKey(0)
    kx, kw, kp = jax.random.split(key, 3)

    x = jax.random.normal(kx, (B, S, D), dtype=jnp.float32)
    # nn.init.uniform_(-0.1, 0.1) equivalents, deterministic:
    weight_W = jax.random.uniform(kw, (D, H), minval=-0.1, maxval=0.1,
                                  dtype=jnp.float32)
    weight_proj = jax.random.uniform(kp, (H, 1), minval=-0.1, maxval=0.1,
                                     dtype=jnp.float32)

    out = jax.block_until_ready(self_attention(x, weight_W, weight_proj))
    ref = self_attention_ref(x, weight_W, weight_proj)

    assert out.shape == (B, D)
    # All math is exact f32 now (no approx reciprocal); tolerance only leaves
    # headroom for hardware matmul accumulation-order differences.
    err = jnp.max(jnp.abs(out - ref))
    assert jnp.allclose(out, ref, atol=1e-3, rtol=1e-3), f"max abs err {err}"

    print("KERNEL_OK")
</pallas_src>

<mosaic_0001>
module attributes {stable_mosaic.version = 11 : i64} {
  func.func @_self_attention_kernel(%arg0: i32, %arg1: memref<16x8x128xf32, #tpu.memory_space<vmem>>, %arg2: memref<128x32xf32, #tpu.memory_space<vmem>>, %arg3: memref<1x32xf32, #tpu.memory_space<vmem>>, %arg4: memref<16x128xf32, #tpu.memory_space<vmem>>) attributes {dimension_semantics = [#tpu.dimension_semantics<parallel>], iteration_bounds = array<i64: 1>, scalar_prefetch = 0 : i64, scratch_operands = 0 : i64, tpu.core_type = #tpu.core_type<tc>, window_params = [{transform_indices = @transform_0, window_bounds = array<i64: 16, 8, 128>}, {pipeline_mode = #tpu.pipeline_mode<synchronous>, transform_indices = @transform_1, window_bounds = array<i64: 128, 32>}, {pipeline_mode = #tpu.pipeline_mode<synchronous>, transform_indices = @transform_2, window_bounds = array<i64: 1, 32>}, {transform_indices = @transform_3, window_bounds = array<i64: 16, 128>}]} {
    %c0 = arith.constant 0 : index
    %c0_0 = arith.constant 0 : index
    %c0_1 = arith.constant 0 : index
    %0 = vector.load %arg1[%c0, %c0_0, %c0_1] : memref<16x8x128xf32, #tpu.memory_space<vmem>>, vector<16x8x128xf32>
    %c0_2 = arith.constant 0 : index
    %c0_3 = arith.constant 0 : index
    %1 = vector.load %arg2[%c0_2, %c0_3] : memref<128x32xf32, #tpu.memory_space<vmem>>, vector<128x32xf32>
    %c0_4 = arith.constant 0 : index
    %c0_5 = arith.constant 0 : index
    %2 = vector.load %arg3[%c0_4, %c0_5] : memref<1x32xf32, #tpu.memory_space<vmem>>, vector<1x32xf32>
    %3 = vector.shape_cast %0 : vector<16x8x128xf32> to vector<128x128xf32>
    %cst = arith.constant dense<0.000000e+00> : vector<128x32xf32>
    %4 = tpu.matmul %3, %1, %cst {dimension_numbers = #tpu.dot_dimension_numbers<[1], [0], [0], [1], [0, 0, 1, 1], [], []>} : vector<128x128xf32>, vector<128x32xf32>, vector<128x32xf32> -> vector<128x32xf32>
    %5 = vector.shape_cast %4 : vector<128x32xf32> to vector<16x8x32xf32>
    %6 = math.tanh %5 : vector<16x8x32xf32>
    %7 = vector.shape_cast %2 : vector<1x32xf32> to vector<1x1x32xf32>
    %8 = vector.broadcast %7 : vector<1x1x32xf32> to vector<16x8x32xf32>
    %9 = arith.mulf %6, %8 : vector<16x8x32xf32>
    %cst_6 = arith.constant dense<0.000000e+00> : vector<16x8xf32>
    %10 = vector.multi_reduction <add>, %9, %cst_6 [2] : vector<16x8x32xf32> to vector<16x8xf32>
    %cst_7 = arith.constant dense<0xFF800000> : vector<16xf32>
    %11 = vector.multi_reduction <maximumf>, %10, %cst_7 [1] : vector<16x8xf32> to vector<16xf32>
    %12 = vector.shape_cast %11 : vector<16xf32> to vector<16x1xf32>
    %13 = vector.broadcast %12 : vector<16x1xf32> to vector<16x8xf32>
    %14 = arith.subf %10, %13 : vector<16x8xf32>
    %15 = math.exp %14 : vector<16x8xf32>
    %cst_8 = arith.constant dense<0.000000e+00> : vector<16xf32>
    %16 = vector.multi_reduction <add>, %15, %cst_8 [1] : vector<16x8xf32> to vector<16xf32>
    %17 = vector.shape_cast %16 : vector<16xf32> to vector<16x1xf32>
    %18 = vector.broadcast %17 : vector<16x1xf32> to vector<16x8xf32>
    %19 = arith.divf %15, %18 : vector<16x8xf32>
    %20 = vector.shape_cast %19 : vector<16x8xf32> to vector<16x8x1xf32>
    %21 = vector.broadcast %20 : vector<16x8x1xf32> to vector<16x8x128xf32>
    %22 = arith.mulf %0, %21 : vector<16x8x128xf32>
    %cst_9 = arith.constant dense<0.000000e+00> : vector<16x128xf32>
    %23 = vector.multi_reduction <add>, %22, %cst_9 [1] : vector<16x8x128xf32> to vector<16x128xf32>
    %c0_10 = arith.constant 0 : index
    %c0_11 = arith.constant 0 : index
    %24 = vector.load %arg4[%c0_10, %c0_11] : memref<16x128xf32, #tpu.memory_space<vmem>>, vector<16x128xf32>
    tpu.vector_store %arg4[%c0_10, %c0_11], %23 {strides = array<i32>} : memref<16x128xf32, #tpu.memory_space<vmem>>, vector<16x128xf32>,
    return
  }
  func.func @transform_0(%arg0: i32) -> (i32, i32, i32) {
    %c0_i32 = arith.constant 0 : i32
    %c0_i32_0 = arith.constant 0 : i32
    %c0_i32_1 = arith.constant 0 : i32
    return %arg0, %c0_i32, %c0_i32_0 : i32, i32, i32
  }
  func.func @transform_1(%arg0: i32) -> (i32, i32) {
    %c0_i32 = arith.constant 0 : i32
    %c0_i32_0 = arith.constant 0 : i32
    %c0_i32_1 = arith.constant 0 : i32
    return %c0_i32, %c0_i32_0 : i32, i32
  }
  func.func @transform_2(%arg0: i32) -> (i32, i32) {
    %c0_i32 = arith.constant 0 : i32
    %c0_i32_0 = arith.constant 0 : i32
    %c0_i32_1 = arith.constant 0 : i32
    return %c0_i32, %c0_i32_0 : i32, i32
  }
  func.func @transform_3(%arg0: i32) -> (i32, i32) {
    %c0_i32 = arith.constant 0 : i32
    %c0_i32_0 = arith.constant 0 : i32
    return %arg0, %c0_i32 : i32, i32
  }
}

</mosaic_0001>

<bundles_post_ra>
// kernel: tpu_custom_call.1
= control target key start
LH: loop header
LB: loop body
LE: loop exit
PB: predicated region body
PF: predicated region fallthrough
CT: control target
= control target key end

     0   :  { %s1824_s0 = inlined_call_operand.vmem [shape: f32[16,8,128], index: 0, kind: input, shape index: {}]   ;;  %s1825_s1 = inlined_call_operand.vmem [shape: f32[128,32], index: 1, kind: input, shape index: {}]   ;;  %s1826_s2 = inlined_call_operand.vmem [shape: f32[1,32], index: 2, kind: input, shape index: {}]   ;;  %s1827_s3 = inlined_call_operand.hbm [shape: f32[16,128], index: 3, kind: output, shape index: {}]  }
   0x1   :  { %v46_v0 = vld [vmem:[%s1825_s1 + $0x78] sm:$0xff]  ;;  %v45_v1 = vld [vmem:[%s1825_s1 + $0x70] sm:$0xff]  ;;  %v44_v2 = vld [vmem:[%s1825_s1 + $0x68] sm:$0xff] }
   0x2   :  { %48 = vmatpush.msra.mxu0 %v46_v0  ;;  %964 = vmatpush.msra.mxu2 %v46_v0  ;;  %v43_v3 = vld [vmem:[%s1825_s1 + $0x60] sm:$0xff]  ;;  %v42_v4 = vld [vmem:[%s1825_s1 + $0x58] sm:$0xff] }
   0x3   :  { %965 = vmatpush.msra.mxu3 %v46_v0  ;;  %963 = vmatpush.msra.mxu1 %v46_v0 }
   0x4   :  { %49 = vmatpush.msra.mxu0 %v45_v1  ;;  %967 = vmatpush.msra.mxu2 %v45_v1 }
   0x5   :  { %968 = vmatpush.msra.mxu3 %v45_v1  ;;  %966 = vmatpush.msra.mxu1 %v45_v1 }
   0x6   :  { %50 = vmatpush.msra.mxu0 %v44_v2  ;;  %970 = vmatpush.msra.mxu2 %v44_v2 }
   0x7   :  { %971 = vmatpush.msra.mxu3 %v44_v2  ;;  %969 = vmatpush.msra.mxu1 %v44_v2 }
   0x8   :  { %51 = vmatpush.msra.mxu0 %v43_v3  ;;  %973 = vmatpush.msra.mxu2 %v43_v3 }
   0x9   :  { %8 = vsyncpa [#allocation3], 0  ;;  %974 = vmatpush.msra.mxu3 %v43_v3  ;;  %v41_v5 = vld [vmem:[%s1825_s1 + $0x50] sm:$0xff]  ;;  %972 = vmatpush.msra.mxu1 %v43_v3  ;;  %v40_v6 = vld [vmem:[%s1825_s1 + $0x48] sm:$0xff]  ;;  %vm148_vm0 = vcmask 261120   ;;  %vm231_vm1 = vcmask 1041409  }
   0xa   :  { %52 = vmatpush.msra.mxu0 %v42_v4  ;;  %976 = vmatpush.msra.mxu2 %v42_v4  ;;  %v39_v7 = vld [vmem:[%s1825_s1 + $0x40] sm:$0xff]  ;;  %v38_v8 = vld [vmem:[%s1825_s1 + $0x38] sm:$0xff]  ;;  %v37_v9 = vld [vmem:[%s1825_s1 + $0x30] sm:$0xff]  ;;  %vm233_vm2 = vcmask 1042434   ;;  %vm235_vm3 = vcmask 1043459   ;;  %vm237_vm4 = vcmask 1044484  }
   0xb   :  { %977 = vmatpush.msra.mxu3 %v42_v4  ;;  %975 = vmatpush.msra.mxu1 %v42_v4  ;;  %v36_v10 = vld [vmem:[%s1825_s1 + $0x28] sm:$0xff]  ;;  %v35_v11 = vld [vmem:[%s1825_s1 + $0x20] sm:$0xff]  ;;  %v34_v12 = vld [vmem:[%s1825_s1 + $0x18] sm:$0xff]  ;;  %vm239_vm5 = vcmask 1045509   ;;  %vm1829_vm6 = vcmask 1046534   ;;  %vm1828_vm7 = vcmask 1047559  }
   0xc   :  { %53 = vmatpush.msra.mxu0 %v41_v5  ;;  %979 = vmatpush.msra.mxu2 %v41_v5  ;;  %v33_v13 = vld [vmem:[%s1825_s1 + $0x10] sm:$0xff]  ;;  %v32_v14 = vld [vmem:[%s1825_s1 + $0x8] sm:$0xff]  ;;  %v31_v15 = vld [vmem:[%s1825_s1] sm:$0xff]  ;;  %vm254_vm8 = vcmask 64512   ;;  %s951_s27 = sshll.u32 %s1827_s3, 4  ;;  %s1159_s28 = smov 128   ;;  %s952_s27 = int_to_ptr.hbm [resolvable:$true] %s951_s27 }
   0xd   :  { %980 = vmatpush.msra.mxu3 %v41_v5  ;;  %978 = vmatpush.msra.mxu1 %v41_v5  ;;  %v15_v16 = vld [vmem:[%s1824_s0] sm:$0xff]  ;;  %v16_v20 = vld [vmem:[%s1824_s0 + $0x8] sm:$0xff]  ;;  %v17_v24 = vld [vmem:[%s1824_s0 + $0x10] sm:$0xff]  ;;  %s1160_s29 = smov 8  }
   0xe   :  { %54 = vmatpush.msra.mxu0 %v40_v6  ;;  %982 = vmatpush.msra.mxu2 %v40_v6  ;;  %v23_v17 = vld [vmem:[%s1824_s0 + $0x40] sm:$0xff]  ;;  %v24_v21 = vld [vmem:[%s1824_s0 + $0x48] sm:$0xff]  ;;  %v25_v25 = vld [vmem:[%s1824_s0 + $0x50] sm:$0xff] }
   0xf   :  { %983 = vmatpush.msra.mxu3 %v40_v6  ;;  %981 = vmatpush.msra.mxu1 %v40_v6  ;;  %v27_v18 = vld [vmem:[%s1824_s0 + $0x60] sm:$0xff]  ;;  %v28_v22 = vld [vmem:[%s1824_s0 + $0x68] sm:$0xff]  ;;  %v29_v26 = vld [vmem:[%s1824_s0 + $0x70] sm:$0xff] }
  0x10   :  { %55 = vmatpush.msra.mxu0 %v39_v7  ;;  %985 = vmatpush.msra.mxu2 %v39_v7  ;;  %v19_v19 = vld [vmem:[%s1824_s0 + $0x20] sm:$0xff]  ;;  %v20_v23 = vld [vmem:[%s1824_s0 + $0x28] sm:$0xff]  ;;  %v21_v27 = vld [vmem:[%s1824_s0 + $0x30] sm:$0xff] }
  0x11   :  { %986 = vmatpush.msra.mxu3 %v39_v7  ;;  %984 = vmatpush.msra.mxu1 %v39_v7  ;;  %v18_v28 = vld [vmem:[%s1824_s0 + $0x18] sm:$0xff]  ;;  %v1280_v34 = vld [vmem:[%s1826_s2] ss:$0 sm:$0xff] }
  0x12   :  { %56 = vmatpush.msra.mxu0 %v38_v8  ;;  %988 = vmatpush.msra.mxu2 %v38_v8  ;;  %v26_v29 = vld [vmem:[%s1824_s0 + $0x58] sm:$0xff] }
  0x13   :  { %989 = vmatpush.msra.mxu3 %v38_v8  ;;  %987 = vmatpush.msra.mxu1 %v38_v8  ;;  %v30_v30 = vld [vmem:[%s1824_s0 + $0x78] sm:$0xff] }
  0x14   :  { %57 = vmatpush.msra.mxu0 %v37_v9  ;;  %991 = vmatpush.msra.mxu2 %v37_v9  ;;  %v22_v31 = vld [vmem:[%s1824_s0 + $0x38] sm:$0xff] }
  0x15   :  { %992 = vmatpush.msra.mxu3 %v37_v9  ;;  %990 = vmatpush.msra.mxu1 %v37_v9 }
  0x16   :  { %58 = vmatpush.msra.mxu0 %v36_v10  ;;  %994 = vmatpush.msra.mxu2 %v36_v10 }
  0x17   :  { %995 = vmatpush.msra.mxu3 %v36_v10  ;;  %993 = vmatpush.msra.mxu1 %v36_v10 }
  0x18   :  { %59 = vmatpush.msra.mxu0 %v35_v11  ;;  %997 = vmatpush.msra.mxu2 %v35_v11 }
  0x19   :  { %998 = vmatpush.msra.mxu3 %v35_v11  ;;  %996 = vmatpush.msra.mxu1 %v35_v11 }
  0x1a   :  { %60 = vmatpush.msra.mxu0 %v34_v12  ;;  %1000 = vmatpush.msra.mxu2 %v34_v12 }
  0x1b   :  { %1001 = vmatpush.msra.mxu3 %v34_v12  ;;  %999 = vmatpush.msra.mxu1 %v34_v12 }
  0x1c   :  { %61 = vmatpush.msra.mxu0 %v33_v13  ;;  %1003 = vmatpush.msra.mxu2 %v33_v13 }
  0x1d   :  { %1004 = vmatpush.msra.mxu3 %v33_v13  ;;  %1002 = vmatpush.msra.mxu1 %v33_v13 }
  0x1e   :  { %62 = vmatpush.msra.mxu0 %v32_v14  ;;  %1006 = vmatpush.msra.mxu2 %v32_v14 }
  0x1f   :  { %1007 = vmatpush.msra.mxu3 %v32_v14  ;;  %1005 = vmatpush.msra.mxu1 %v32_v14 }
  0x20   :  { %63 = vmatpush.msra.mxu0 %v31_v15  ;;  %1009 = vmatpush.msra.mxu2 %v31_v15 }
  0x21   :  { %1010 = vmatpush.msra.mxu3 %v31_v15  ;;  %64 = vmatmul.f32.vlgmr.msra.gmra.mxu0 %v15_v16 }
  0x22   :  { %88 = vmatmul.f32.vlgmr.msra.gmra.mxu2 %v23_v17  ;;  %100 = vmatmul.f32.vlgmr.msra.gmra.mxu3 %v27_v18 }
  0x23   :  { %1008 = vmatpush.msra.mxu1 %v31_v15 }
  0x24   :  { %76 = vmatmul.f32.vlgmr.msra.gmra.mxu1 %v19_v19 }
  0x29   :  { %67 = vmatmul.f32.gmra.mxu0 %v16_v20 }
  0x2a   :  { %91 = vmatmul.f32.gmra.mxu2 %v24_v21  ;;  %103 = vmatmul.f32.gmra.mxu3 %v28_v22 }
  0x2c   :  { %79 = vmatmul.f32.gmra.mxu1 %v20_v23 }
  0x31   :  { %70 = vmatmul.f32.gmra.mxu0 %v17_v24 }
  0x32   :  { %94 = vmatmul.f32.gmra.mxu2 %v25_v25  ;;  %106 = vmatmul.f32.gmra.mxu3 %v29_v26 }
  0x34   :  { %82 = vmatmul.f32.gmra.mxu1 %v21_v27 }
  0x39   :  { %73 = vmatmul.f32.gmra.mxu0 %v18_v28 }
  0x3a   :  { %97 = vmatmul.f32.gmra.mxu2 %v26_v29  ;;  %109 = vmatmul.f32.gmra.mxu3 %v30_v30 }
  0x3c   :  { %85 = vmatmul.f32.gmra.mxu1 %v22_v31 }
  0x9e   :  { %v65_v32 = vpop.f32.mrf.mxu0 }
  0x9f   :  { %1019 = vtanh.f32 %v65_v32 }
  0xa1   :  { %v77_v33 = vpop.f32.mrf.mxu1 }
  0xa2   :  { %1021 = vtanh.f32 %v77_v33 }
  0xa5   :  { %v1020_v35 = vpop.eup %1019  ;;  %v89_v36 = vpop.f32.mrf.mxu2 }
  0xa6   :  { %v101_v37 = vpop.f32.mrf.mxu3  ;;  %1023 = vtanh.f32 %v89_v36  ;;  %v132_v38 = vmul.f32 %v1020_v35, %v1280_v34  ;;  %v68_v39 = vpop.f32.mrf.mxu0 }
  0xa7   :  { %1025 = vtanh.f32 %v101_v37 }
  0xa8   :  { %v1022_v40 = vpop.eup %1021  ;;  %v149_v41 = vsel %vm148_vm0, %v132_v38, 0.0 }
  0xa9   :  { %150 = vadd.xlane.f32.xlu0 %v149_v41  ;;  %v80_v42 = vpop.f32.mrf.mxu1  ;;  %v136_v43 = vmul.f32 %v1022_v40, %v1280_v34  ;;  %v213_v40 = vlaneseq }
  0xaa   :  { %1027 = vtanh.f32 %v80_v42 }
  0xab   :  { %1029 = vtanh.f32 %v68_v39  ;;  %v161_v44 = vsel %vm148_vm0, %v136_v43, 0.0 }
  0xac   :  { %v1024_v45 = vpop.eup %1023  ;;  %162 = vadd.xlane.f32.xlu2 %v161_v44  ;;  %v1330_v44 = vand.u32 127, %v213_v40 }
  0xad   :  { %v1026_v46 = vpop.eup %1025  ;;  %v92_v47 = vpop.f32.mrf.mxu2  ;;  %v140_v49 = vmul.f32 %v1024_v45, %v1280_v34 }
  0xae   :  { %v104_v48 = vpop.f32.mrf.mxu3  ;;  %v144_v50 = vmul.f32 %v1026_v46, %v1280_v34  ;;  %v71_v51 = vpop.f32.mrf.mxu0 }
  0xaf   :  { %1031 = vtanh.f32 %v104_v48  ;;  %v173_v52 = vsel %vm148_vm0, %v140_v49, 0.0 }
  0xb0   :  { %v1028_v53 = vpop.eup %1027  ;;  %1033 = vtanh.f32 %v92_v47  ;;  %174 = vadd.xlane.f32.xlu1 %v173_v52  ;;  %v185_v54 = vsel %vm148_vm0, %v144_v50, 0.0 }
  0xb1   :  { %v1030_v55 = vpop.eup %1029  ;;  %186 = vadd.xlane.f32.xlu0 %v185_v54  ;;  %1035 = vtanh.f32 %v71_v51  ;;  %v83_v56 = vpop.f32.mrf.mxu1  ;;  %v137_v57 = vmul.f32 %v1028_v53, %v1280_v34 }
  0xb2   :  { %1037 = vtanh.f32 %v83_v56  ;;  %v133_v58 = vmul.f32 %v1030_v55, %v1280_v34 }
  0xb3   :  { %v164_v61 = vsel %vm148_vm0, %v137_v57, 0.0 }
  0xb4   :  { %v152_v5 = vsel %vm148_vm0, %v133_v58, 0.0 }
  0xb5   :  { %v1032_v59 = vpop.eup %1031  ;;  %v95_v60 = vpop.f32.mrf.mxu2 }
  0xb6   :  { %v107_v62 = vpop.f32.mrf.mxu3  ;;  %v1034_v63 = vpop.eup %1033  ;;  %v145_v0 = vmul.f32 %v1032_v59, %v1280_v34  ;;  %1039 = vtanh.f32 %v95_v60 }
  0xb7   :  { %v74_v1 = vpop.f32.mrf.mxu0  ;;  %v1036_v2 = vpop.eup %1035  ;;  %v141_v6 = vmul.f32 %v1034_v63, %v1280_v34 }
  0xb8   :  { %v1038_v3 = vpop.eup %1037  ;;  %v188_v4 = vsel %vm148_vm0, %v145_v0, 0.0  ;;  %165 = vadd.xlane.f32.xlu1 %v164_v61  ;;  %1041 = vtanh.f32 %v74_v1  ;;  %v134_v7 = vmul.f32 %v1036_v2, %v1280_v34 }
  0xb9   :  { %189 = vadd.xlane.f32.xlu2 %v188_v4  ;;  %153 = vadd.xlane.f32.xlu0 %v152_v5  ;;  %v138_v8 = vmul.f32 %v1038_v3, %v1280_v34  ;;  %v176_v10 = vsel %vm148_vm0, %v141_v6, 0.0  ;;  %v86_v11 = vpop.f32.mrf.mxu1 }
  0xba   :  { %v155_v13 = vsel %vm148_vm0, %v134_v7, 0.0 }
  0xbb   :  { %v167_v14 = vsel %vm148_vm0, %v138_v8, 0.0 }
  0xbc   :  { %v1040_v12 = vpop.eup %1039 }
  0xbd   :  { %v98_v9 = vpop.f32.mrf.mxu2  ;;  %v142_v17 = vmul.f32 %v1040_v12, %v1280_v34 }
  0xbe   :  { %1043 = vtanh.f32 %v98_v9  ;;  %v110_v15 = vpop.f32.mrf.mxu3  ;;  %v1042_v16 = vpop.eup %1041 }
  0xbf   :  { %1045 = vtanh.f32 %v107_v62  ;;  %v135_v18 = vmul.f32 %v1042_v16, %v1280_v34  ;;  %v179_v23 = vsel %vm148_vm0, %v142_v17, 0.0 }
  0xc0   :  { %177 = vadd.xlane.f32.xlu1 %v176_v10  ;;  %1047 = vtanh.f32 %v86_v11 }
  0xc1   :  { %156 = vadd.xlane.f32.xlu2 %v155_v13  ;;  %168 = vadd.xlane.f32.xlu0 %v167_v14  ;;  %1049 = vtanh.f32 %v110_v15  ;;  %v158_v24 = vsel %vm148_vm0, %v135_v18, 0.0 }
  0xc4   :  { %v1044_v19 = vpop.eup %1043 }
  0xc5   :  { %v1046_v20 = vpop.eup %1045  ;;  %v143_v21 = vmul.f32 %v1044_v19, %v1280_v34  ;;  %v1157_v19 = vmov 0  }
  0xc6   :  { %v1048_v22 = vpop.eup %1047  ;;  %v146_v27 = vmul.f32 %v1046_v20, %v1280_v34  ;;  %1017 = vset.pattern.permute.xlu2 %v1157_v19  ;;  %1016 = vset.pattern.permute.xlu1 %v1157_v19 }
  0xc7   :  { %v1050_v25 = vpop.eup %1049  ;;  %v182_v26 = vsel %vm148_vm0, %v143_v21, 0.0  ;;  %v139_v28 = vmul.f32 %v1048_v22, %v1280_v34  ;;  %1015 = vset.pattern.permute.xlu0 %v1157_v19 }
  0xc8   :  { %183 = vadd.xlane.f32.xlu1 %v182_v26  ;;  %v147_v29 = vmul.f32 %v1050_v25, %v1280_v34  ;;  %v191_v30 = vsel %vm148_vm0, %v146_v27, 0.0 }
  0xc9   :  { %180 = vadd.xlane.f32.xlu2 %v179_v23  ;;  %159 = vadd.xlane.f32.xlu0 %v158_v24  ;;  %v170_v31 = vsel %vm148_vm0, %v139_v28, 0.0 }
  0xca   :  { %v194_v32 = vsel %vm148_vm0, %v147_v29, 0.0 }
  0xd0   :  { %192 = vadd.xlane.f32.xlu1 %v191_v30 }
  0xd1   :  { %171 = vadd.xlane.f32.xlu2 %v170_v31  ;;  %195 = vadd.xlane.f32.xlu0 %v194_v32 }
 0x11c   :  { %v1314_v33 = vpop.xlane.xlu0 %150 }
 0x11d   :  { %v215_v48 = vperm.slane %v1314_v33, %v1330_v44 }
 0x11f   :  { %v1316_v35 = vpop.xlane.xlu2 %162 }
 0x120   :  { %v219_v57 = vperm.slane %v1316_v35, %v1330_v44 }
 0x123   :  { %v1318_v36 = vpop.xlane.xlu1 %174 }
 0x124   :  { %v1320_v37 = vpop.xlane.xlu0 %186  ;;  %v223_v50 = vperm.slane %v1318_v36, %v1330_v44 }
 0x125   :  { %v227_v62 = vperm.slane %v1320_v37, %v1330_v44 }
 0x12b   :  { %v1322_v38 = vpop.xlane.xlu1 %165 }
 0x12c   :  { %v1324_v34 = vpop.xlane.xlu2 %189  ;;  %v154_v39 = vpop.xlane.xlu0 %153  ;;  %v220_v1 = vperm.slane %v1322_v38, %v1330_v44 }
 0x12d   :  { %v216_v45 = vperm.slane %v154_v39, %v1330_v44  ;;  %v228_v3 = vperm.slane %v1324_v34, %v1330_v44 }
 0x12f   :  { %v232_v54 = vsel %vm231_vm1, %v216_v45, %v215_v48 }
 0x133   :  { %v1326_v41 = vpop.xlane.xlu1 %177 }
 0x134   :  { %v157_v42 = vpop.xlane.xlu2 %156  ;;  %v1328_v43 = vpop.xlane.xlu0 %168  ;;  %v224_v46 = vperm.slane %v1326_v41, %v1330_v44 }
 0x135   :  { %v217_v47 = vperm.slane %v157_v42, %v1330_v44  ;;  %v221_v6 = vperm.slane %v1328_v43, %v1330_v44 }
 0x136   :  { %v245_v58 = vsel %vm231_vm1, %v224_v46, %v223_v50 }
 0x137   :  { %v234_v59 = vsel %vm233_vm2, %v217_v47, %v232_v54 }
 0x13b   :  { %v1338_v49 = vpop.xlane.xlu1 %183 }
 0x13c   :  { %v226_v51 = vperm.slane %v1338_v49, %v1330_v44  ;;  %v1344_v52 = vpop.xlane.xlu2 %180  ;;  %v160_v53 = vpop.xlane.xlu0 %159 }
 0x13d   :  { %v225_v55 = vperm.slane %v1344_v52, %v1330_v44  ;;  %v218_v56 = vperm.slane %v160_v53, %v1330_v44 }
 0x13f   :  { %v246_v60 = vsel %vm233_vm2, %v225_v55, %v245_v58  ;;  %v236_v61 = vsel %vm235_vm3, %v218_v56, %v234_v59 }
 0x140   :  { %v247_v63 = vsel %vm235_vm3, %v226_v51, %v246_v60  ;;  %v238_v0 = vsel %vm237_vm4, %v219_v57, %v236_v61 }
 0x141   :  { %v248_v2 = vsel %vm237_vm4, %v227_v62, %v247_v63  ;;  %v240_v5 = vsel %vm239_vm5, %v220_v1, %v238_v0 }
 0x142   :  { %v249_v12 = vsel %vm239_vm5, %v228_v3, %v248_v2  ;;  %v242_v13 = vsel %vm1829_vm6, %v221_v6, %v240_v5 }
 0x143   :  { %v1365_v4 = vpop.xlane.xlu1 %192 }
 0x144   :  { %v229_v7 = vperm.slane %v1365_v4, %v1330_v44  ;;  %v172_v8 = vpop.xlane.xlu2 %171  ;;  %v1372_v9 = vpop.xlane.xlu0 %195 }
 0x145   :  { %v222_v10 = vperm.slane %v172_v8, %v1330_v44  ;;  %v230_v11 = vperm.slane %v1372_v9, %v1330_v44 }
 0x146   :  { %v250_v14 = vsel %vm1829_vm6, %v229_v7, %v249_v12 }
 0x147   :  { %v244_v15 = vsel %vm1828_vm7, %v222_v10, %v242_v13  ;;  %v251_v16 = vsel %vm1828_vm7, %v230_v11, %v250_v14 }
 0x148   :  { %v255_v17 = vsel %vm254_vm8, %v244_v15, -inf  ;;  %v258_v18 = vsel %vm254_vm8, %v251_v16, -inf }
 0x149   :  { %256 = vmax.xlane.f32.xlu1 %v255_v17  ;;  %259 = vmax.xlane.f32.xlu2 %v258_v18 }
 0x1bc   :  { %v257_v20 = vpop.xlane.xlu1 %256  ;;  %v1386_v46 = vpop.xlane.xlu2 %259 }
 0x1bd   :  { %v264_v21 = vperm.slane %v257_v20, 1  ;;  %v263_v22 = vperm.slane %v257_v20, 0  ;;  %v265_v23 = vperm.slane %v257_v20, 2  ;;  %v267_v27 = vperm.slane %v257_v20, 4 }
 0x1be   :  { %v270_v28 = vperm.slane %v257_v20, 7  ;;  %v266_v29 = vperm.slane %v257_v20, 3  ;;  %v268_v54 = vperm.slane %v257_v20, 5  ;;  %v272_v59 = vperm.slane %v1386_v46, 1 }
 0x1bf   :  { %v296_v24 = vsub.f32 %v154_v39, %v264_v21  ;;  %v295_v25 = vsub.f32 %v1314_v33, %v263_v22  ;;  %v297_v26 = vsub.f32 %v157_v42, %v265_v23  ;;  %v299_v40 = vsub.f32 %v1316_v35, %v267_v27 }
 0x1c0   :  { %v302_v45 = vsub.f32 %v172_v8, %v270_v28  ;;  %v298_v47 = vsub.f32 %v160_v53, %v266_v29  ;;  %v269_v39 = vperm.slane %v257_v20, 6  ;;  %v273_v33 = vperm.slane %v1386_v46, 2 }
 0x1c1   :  { %v313_v30 = vmul.f32 1.442695, %v296_v24  ;;  %v311_v31 = vmul.f32 1.442695, %v295_v25  ;;  %v315_v32 = vmul.f32 1.442695, %v297_v26  ;;  %v300_v57 = vsub.f32 %v1322_v38, %v268_v54 }
 0x1c2   :  { %v319_v48 = vmul.f32 1.442695, %v299_v40  ;;  %v325_v50 = vmul.f32 1.442695, %v302_v45  ;;  %v317_v51 = vmul.f32 1.442695, %v298_v47  ;;  %v301_v53 = vsub.f32 %v1328_v43, %v269_v39 }
 0x1c3   :  { %1051 = vpow2.f32 %v313_v30  ;;  %v305_v56 = vsub.f32 %v1344_v52, %v273_v33  ;;  %v276_v61 = vperm.slane %v1386_v46, 5  ;;  %v321_v63 = vmul.f32 1.442695, %v300_v57 }
 0x1c4   :  { %1053 = vpow2.f32 %v311_v31  ;;  %v323_v58 = vmul.f32 1.442695, %v301_v53  ;;  %v271_v0 = vperm.slane %v1386_v46, 0  ;;  %v304_v38 = vsub.f32 %v1326_v41, %v272_v59 }
 0x1c5   :  { %1055 = vpow2.f32 %v315_v32  ;;  %v331_v60 = vmul.f32 1.442695, %v305_v56  ;;  %v308_v52 = vsub.f32 %v1324_v34, %v276_v61  ;;  %v275_v5 = vperm.slane %v1386_v46, 4 }
 0x1c6   :  { %1057 = vpow2.f32 %v319_v48  ;;  %v303_v2 = vsub.f32 %v1318_v36, %v271_v0  ;;  %v329_v3 = vmul.f32 1.442695, %v304_v38  ;;  %v274_v10 = vperm.slane %v1386_v46, 3 }
 0x1c7   :  { %1059 = vpow2.f32 %v325_v50  ;;  %v337_v6 = vmul.f32 1.442695, %v308_v52  ;;  %v307_v36 = vsub.f32 %v1320_v37, %v275_v5  ;;  %v278_v13 = vperm.slane %v1386_v46, 7 }
 0x1c8   :  { %1061 = vpow2.f32 %v317_v51  ;;  %v327_v8 = vmul.f32 1.442695, %v303_v2  ;;  %v306_v34 = vsub.f32 %v1338_v49, %v274_v10  ;;  %v277_v16 = vperm.slane %v1386_v46, 6 }
 0x1c9   :  { %v1389_v42 = vpop.eup %1051  ;;  %1063 = vpow2.f32 %v323_v58  ;;  %v335_v12 = vmul.f32 1.442695, %v307_v36  ;;  %v310_v37 = vsub.f32 %v1372_v9, %v278_v13 }
 0x1ca   :  { %v1391_v55 = vpop.eup %1053  ;;  %363 = vperm.xlu1 %1016, %v1389_v42   ;;  %1065 = vpow2.f32 %v331_v60  ;;  %v333_v15 = vmul.f32 1.442695, %v306_v34  ;;  %v309_v49 = vsub.f32 %v1365_v4, %v277_v16 }
 0x1cb   :  { %v1394_v35 = vpop.eup %1055  ;;  %360 = vperm.xlu0 %1015, %v1391_v55   ;;  %1067 = vpow2.f32 %v321_v63  ;;  %v341_v19 = vmul.f32 1.442695, %v310_v37 }
 0x1cc   :  { %366 = vperm.xlu2 %1017, %v1394_v35   ;;  %v1403_v62 = vpop.eup %1057  ;;  %1069 = vpow2.f32 %v329_v3  ;;  %v339_v21 = vmul.f32 1.442695, %v309_v49 }
 0x1cd   :  { %v1406_v43 = vpop.eup %1059  ;;  %1071 = vpow2.f32 %v337_v6 }
 0x1ce   :  { %v1409_v1 = vpop.eup %1061  ;;  %1073 = vpow2.f32 %v327_v8 }
 0x1cf   :  { %v1417_v7 = vpop.eup %1063  ;;  %1075 = vpow2.f32 %v335_v12 }
 0x1d0   :  { %v1420_v11 = vpop.eup %1065  ;;  %1077 = vpow2.f32 %v333_v15 }
 0x1d1   :  { %v1423_v41 = vpop.eup %1067  ;;  %1079 = vpow2.f32 %v341_v19 }
 0x1d2   :  { %372 = vperm.xlu1 %1016, %v1403_v62   ;;  %v1430_v14 = vpop.eup %1069  ;;  %1081 = vpow2.f32 %v339_v21 }
 0x1d3   :  { %381 = vperm.xlu0 %1015, %v1406_v43   ;;  %v1433_v17 = vpop.eup %1071 }
 0x1d4   :  { %369 = vperm.xlu2 %1017, %v1409_v1   ;;  %v1436_v18 = vpop.eup %1073 }
 0x1d5   :  { %v1442_v20 = vpop.eup %1075 }
 0x1d6   :  { %v1445_v22 = vpop.eup %1077 }
 0x1d7   :  { %v1448_v23 = vpop.eup %1079 }
 0x1d8   :  { %v1451_v9 = vpop.eup %1081 }
 0x1da   :  { %378 = vperm.xlu1 %1016, %v1417_v7  }
 0x1db   :  { %390 = vperm.xlu0 %1015, %v1420_v11  }
 0x1dc   :  { %375 = vperm.xlu2 %1017, %v1423_v41  }
 0x1e2   :  { %387 = vperm.xlu1 %1016, %v1430_v14  }
 0x1e3   :  { %399 = vperm.xlu0 %1015, %v1433_v17  }
 0x1e4   :  { %384 = vperm.xlu2 %1017, %v1436_v18  }
 0x1ea   :  { %396 = vperm.xlu1 %1016, %v1442_v20  }
 0x1ec   :  { %393 = vperm.xlu2 %1017, %v1445_v22  }
 0x1f2   :  { %405 = vperm.xlu1 %1016, %v1448_v23  }
 0x1f4   :  { %402 = vperm.xlu2 %1017, %v1451_v9  }
 0x226   :  { %v367_v4 = vpop.permute.xlu2 %366 }
 0x227   :  { %v409_v32 = vperm.slane %v367_v4, %v1330_v44 }
 0x22e   :  { %v370_v24 = vpop.permute.xlu2 %369 }
 0x22f   :  { %v410_v46 = vperm.slane %v370_v24, %v1330_v44 }
 0x236   :  { %v376_v29 = vpop.permute.xlu2 %375 }
 0x237   :  { %v412_v50 = vperm.slane %v376_v29, %v1330_v44 }
 0x23c   :  { %v364_v25 = vpop.permute.xlu1 %363 }
 0x23d   :  { %v361_v26 = vpop.permute.xlu0 %360  ;;  %v408_v27 = vperm.slane %v364_v25, %v1330_v44 }
 0x23e   :  { %v407_v28 = vperm.slane %v361_v26, %v1330_v44  ;;  %v385_v51 = vpop.permute.xlu2 %384 }
 0x23f   :  { %v415_v0 = vperm.slane %v385_v51, %v1330_v44 }
 0x240   :  { %v423_v30 = vsel %vm231_vm1, %v408_v27, %v407_v28 }
 0x241   :  { %v424_v40 = vsel %vm233_vm2, %v409_v32, %v423_v30 }
 0x242   :  { %v425_v47 = vsel %vm235_vm3, %v410_v46, %v424_v40 }
 0x244   :  { %v373_v31 = vpop.permute.xlu1 %372 }
 0x245   :  { %v411_v45 = vperm.slane %v373_v31, %v1330_v44  ;;  %v382_v48 = vpop.permute.xlu0 %381 }
 0x246   :  { %v414_v53 = vperm.slane %v382_v48, %v1330_v44  ;;  %v394_v38 = vpop.permute.xlu2 %393 }
 0x247   :  { %v426_v39 = vsel %vm237_vm4, %v411_v45, %v425_v47  ;;  %v418_v6 = vperm.slane %v394_v38, %v1330_v44 }
 0x248   :  { %v427_v56 = vsel %vm239_vm5, %v412_v50, %v426_v39 }
 0x24c   :  { %v379_v33 = vpop.permute.xlu1 %378 }
 0x24d   :  { %v413_v54 = vperm.slane %v379_v33, %v1330_v44  ;;  %v391_v60 = vpop.permute.xlu0 %390 }
 0x24e   :  { %v417_v2 = vperm.slane %v391_v60, %v1330_v44  ;;  %v403_v12 = vpop.permute.xlu2 %402 }
 0x24f   :  { %v428_v57 = vsel %vm1829_vm6, %v413_v54, %v427_v56  ;;  %v421_v16 = vperm.slane %v403_v12, %v1330_v44 }
 0x250   :  { %v429_v58 = vsel %vm1828_vm7, %v414_v53, %v428_v57 }
 0x251   :  { %v439_v59 = vsel %vm254_vm8, %v429_v58, 0.0 }
 0x252   :  { %440 = vadd.xlane.f32.xlu0 %v439_v59 }
 0x254   :  { %v388_v61 = vpop.permute.xlu1 %387 }
 0x255   :  { %v416_v63 = vperm.slane %v388_v61, %v1330_v44  ;;  %v400_v10 = vpop.permute.xlu0 %399 }
 0x256   :  { %v420_v13 = vperm.slane %v400_v10, %v1330_v44 }
 0x257   :  { %v430_v52 = vsel %vm231_vm1, %v416_v63, %v415_v0 }
 0x258   :  { %v431_v3 = vsel %vm233_vm2, %v417_v2, %v430_v52 }
 0x259   :  { %v432_v36 = vsel %vm235_vm3, %v418_v6, %v431_v3 }
 0x25c   :  { %v397_v5 = vpop.permute.xlu1 %396 }
 0x25d   :  { %v419_v8 = vperm.slane %v397_v5, %v1330_v44 }
 0x25f   :  { %v433_v34 = vsel %vm237_vm4, %v419_v8, %v432_v36 }
 0x260   :  { %v434_v15 = vsel %vm239_vm5, %v420_v13, %v433_v34 }
 0x261   :  { %v435_v19 = vsel %vm1829_vm6, %v421_v16, %v434_v15 }
 0x264   :  { %v406_v37 = vpop.permute.xlu1 %405 }
 0x265   :  { %v422_v49 = vperm.slane %v406_v37, %v1330_v44 }
 0x267   :  { %v436_v21 = vsel %vm1828_vm7, %v422_v49, %v435_v19 }
 0x268   :  { %v442_v4 = vsel %vm254_vm8, %v436_v21, 0.0 }
 0x269   :  { %443 = vadd.xlane.f32.xlu2 %v442_v4 }
 0x2c5   :  { %v1486_v24 = vpop.xlane.xlu0 %440 }
 0x2c6   :  { %v447_v25 = vperm.slane %v1486_v24, 0  ;;  %v1490_v26 = vperm.slane %v1486_v24, 1  ;;  %v1493_v27 = vperm.slane %v1486_v24, 2  ;;  %v1496_v28 = vperm.slane %v1486_v24, 3 }
 0x2c7   :  { %v453_v44 = vperm.slane %v1486_v24, 6  ;;  %v1502_v29 = vperm.slane %v1486_v24, 4  ;;  %v1517_v33 = vperm.slane %v1486_v24, 5 }
 0x2c8   :  { %1083 = vrcp.f32 %v447_v25  ;;  %v488_v45 = vand.u32 2147483647, %v447_v25  ;;  %v490_v39 = vand.u32 2147483648, %v447_v25  ;;  %vm484_vm10 = vweird.f32 %v447_v25 }
 0x2c9   :  { %1085 = vrcp.f32 %v1490_v26  ;;  %v578_v51 = vand.u32 2147483647, %v453_v44  ;;  %vm574_vm9 = vweird.f32 %v453_v44  ;;  %v580_v58 = vand.u32 2147483648, %v453_v44 }
 0x2ca   :  { %1087 = vrcp.f32 %v1493_v27  ;;  %vm1521_vm12 = vcmp.eq.f32.partialorder %v488_v45, 8.507059e+37  ;;  %v491_v52 = vor.u32 1.1754944e-38, %v490_v39  ;;  %vm499_vm15 = vweird.f32 %v1490_v26 }
 0x2cb   :  { %1089 = vrcp.f32 %v1496_v28  ;;  %vm1528_vm13 = vcmp.eq.f32.partialorder %v578_v51, 8.507059e+37  ;;  %v503_v5 = vand.u32 2147483647, %v1490_v26  ;;  %v505_v6 = vand.u32 2147483648, %v1490_v26 }
 0x2cc   :  { %1091 = vrcp.f32 %v453_v44  ;;  %v581_v34 = vor.u32 1.1754944e-38, %v580_v58  ;;  %v518_v4 = vand.u32 2147483647, %v1493_v27  ;;  %v533_v58 = vand.u32 2147483647, %v1496_v28 }
 0x2cd   :  { %1093 = vrcp.f32 %v1502_v29 }
 0x2ce   :  { %v1084_v30 = vpop.eup %1083  ;;  %1095 = vrcp.f32 %v1517_v33 }
 0x2cf   :  { %v1505_v31 = vpop.eup %1085  ;;  %v480_v32 = vmul.f32 %v1084_v30, %v447_v25  ;;  %vm485_vm11 = vweird.f32 %v1084_v30 }
 0x2d0   :  { %v1508_v40 = vpop.eup %1087  ;;  %v495_v46 = vmul.f32 %v1505_v31, %v1490_v26  ;;  %vm486_vm14 = vmor %vm484_vm10, %vm485_vm11  ;;  %vm500_vm0 = vweird.f32 %v1505_v31  ;;  %vm1551_vm11 = vcmp.eq.f32.partialorder %v503_v5, 8.507059e+37  ;;  %v520_v26 = vand.u32 2147483648, %v1493_v27 }
 0x2d1   :  { %v1512_v47 = vpop.eup %1089  ;;  %v481_v48 = vsub.f32 1.0, %v480_v32  ;;  %v510_v50 = vmul.f32 %v1508_v40, %v1493_v27  ;;  %vm1547_vm10 = vmor %vm499_vm15, %vm500_vm0  ;;  %vm515_vm15 = vweird.f32 %v1508_v40  ;;  %v548_v5 = vand.u32 2147483647, %v1502_v29 }
 0x2d2   :  { %v496_v54 = vsub.f32 1.0, %v495_v46  ;;  %v525_v53 = vmul.f32 %v1512_v47, %v1496_v28  ;;  %v1092_v57 = vpop.eup %1091  ;;  %vm530_vm0 = vweird.f32 %v1512_v47 }
 0x2d3   :  { %v482_v56 = vmul.f32 %v1084_v30, %v481_v48  ;;  %v511_v61 = vsub.f32 1.0, %v510_v50  ;;  %v1526_v63 = vpop.eup %1093  ;;  %v570_v0 = vmul.f32 %v1092_v57, %v453_v44  ;;  %vm575_vm8 = vweird.f32 %v1092_v57 }
 0x2d4   :  { %v497_v60 = vmul.f32 %v1505_v31, %v496_v54  ;;  %v526_v2 = vsub.f32 1.0, %v525_v53  ;;  %v540_v15 = vmul.f32 %v1526_v63, %v1502_v29  ;;  %v535_v54 = vand.u32 2147483648, %v1496_v28  ;;  %v1592_v59 = vpop.eup %1095 }
 0x2d5   :  { %v483_v38 = vadd.f32 %v1084_v30, %v482_v56  ;;  %v571_v8 = vsub.f32 1.0, %v570_v0  ;;  %v512_v13 = vmul.f32 %v1508_v40, %v511_v61 }
 0x2d6   :  { %v498_v36 = vadd.f32 %v1505_v31, %v497_v60  ;;  %v527_v49 = vmul.f32 %v1512_v47, %v526_v2  ;;  %v541_v46 = vsub.f32 1.0, %v540_v15  ;;  %v521_v60 = vor.u32 1.1754944e-38, %v520_v26 }
 0x2d7   :  { %v487_v10 = vsel %vm486_vm14, %v1084_v30, %v483_v38  ;;  %v572_v16 = vmul.f32 %v1092_v57, %v571_v8  ;;  %v506_v30 = vor.u32 1.1754944e-38, %v505_v6  ;;  %vm576_vm14 = vmor %vm574_vm9, %vm575_vm8  ;;  %v513_v45 = vadd.f32 %v1508_v40, %v512_v13 }
 0x2d8   :  { %v492_v12 = vsel %vm1521_vm12, %v491_v52, %v487_v10  ;;  %vm514_vm12 = vweird.f32 %v1493_v27  ;;  %v528_v50 = vadd.f32 %v1512_v47, %v527_v49  ;;  %vm529_vm9 = vweird.f32 %v1496_v28 }
 0x2d9   :  { %v493_v37 = vmul.f32 %v1391_v55, %v492_v12  ;;  %v573_v25 = vadd.f32 %v1092_v57, %v572_v16  ;;  %v502_v55 = vsel %vm1547_vm10, %v1505_v31, %v498_v36  ;;  %vm1587_vm8 = vmor %vm514_vm12, %vm515_vm15  ;;  %v550_v27 = vand.u32 2147483648, %v1502_v29 }
 0x2da   :  { %v507_v51 = vsel %vm1551_vm11, %v506_v30, %v502_v55  ;;  %v542_v38 = vmul.f32 %v1526_v63, %v541_v46  ;;  %vm519_vm10 = vcmp.eq.f32.partialorder %v518_v4, 8.507059e+37  ;;  %vm534_vm11 = vcmp.eq.f32.partialorder %v533_v58, 8.507059e+37 }
 0x2db   :  { %721 = vperm.xlu1 %1016, %v493_v37   ;;  %v577_v48 = vsel %vm576_vm14, %v1092_v57, %v573_v25  ;;  %v508_v28 = vmul.f32 %v1389_v42, %v507_v51  ;;  %v1612_v6 = vor.u32 1.1754944e-38, %v550_v27  ;;  %vm545_vm12 = vweird.f32 %v1526_v63 }
 0x2dc   :  { %v1562_v32 = vpop.xlane.xlu2 %443  ;;  %v582_v44 = vsel %vm1528_vm13, %v581_v34, %v577_v48  ;;  %vm531_vm13 = vmor %vm529_vm9, %vm530_vm0  ;;  %v1620_v10 = vadd.f32 %v1526_v63, %v542_v38  ;;  %v555_v49 = vmul.f32 %v1592_v59, %v1517_v33  ;;  %vm544_vm15 = vweird.f32 %v1502_v29 }
 0x2dd   :  { %v1568_v39 = vperm.slane %v1562_v32, 0  ;;  %v1571_v31 = vperm.slane %v1562_v32, 1  ;;  %v583_v53 = vmul.f32 %v1417_v7, %v582_v44  ;;  %v1582_v56 = vperm.slane %v1562_v32, 4 }
 0x2de   :  { %v517_v7 = vsel %vm1587_vm8, %v1508_v40, %v513_v45  ;;  %v1602_v61 = vperm.slane %v1562_v32, 6  ;;  %v532_v0 = vsel %vm531_vm13, %v1512_v47, %v528_v50  ;;  %v1608_v52 = vperm.slane %v1562_v32, 7 }
 0x2df   :  { %1097 = vrcp.f32 %v1568_v39  ;;  %751 = vperm.xlu2 %1017, %v583_v53   ;;  %v536_v40 = vor.u32 1.1754944e-38, %v535_v54  ;;  %v522_v2 = vsel %vm519_vm10, %v521_v60, %v517_v7  ;;  %v1615_v47 = vperm.slane %v1562_v32, 2 }
 0x2e0   :  { %1099 = vrcp.f32 %v1571_v31  ;;  %v623_v8 = vand.u32 2147483647, %v1571_v31  ;;  %v523_v34 = vmul.f32 %v1394_v35, %v522_v2  ;;  %v625_v12 = vand.u32 2147483648, %v1571_v31 }
 0x2e1   :  { %1101 = vrcp.f32 %v1582_v56  ;;  %v537_v3 = vsel %vm534_vm11, %v536_v40, %v532_v0  ;;  %v608_v16 = vand.u32 2147483647, %v1568_v39  ;;  %v1633_v19 = vperm.slane %v1562_v32, 3 }
 0x2e2   :  { %1103 = vrcp.f32 %v1602_v61  ;;  %v538_v37 = vmul.f32 %v1409_v1, %v537_v3  ;;  %vm619_vm14 = vweird.f32 %v1571_v31  ;;  %v610_v21 = vand.u32 2147483648, %v1568_v39 }
 0x2e3   :  { %726 = vperm.xlu1 %1016, %v508_v28   ;;  %1105 = vrcp.f32 %v1608_v52  ;;  %vm1641_vm0 = vcmp.eq.f32.partialorder %v623_v8, 8.507059e+37  ;;  %vm604_vm9 = vweird.f32 %v1568_v39  ;;  %v626_v55 = vor.u32 1.1754944e-38, %v625_v12 }
 0x2e4   :  { %1107 = vrcp.f32 %v1615_v47  ;;  %vm1650_vm10 = vcmp.eq.f32.partialorder %v608_v16, 8.507059e+37  ;;  %vm664_vm11 = vweird.f32 %v1582_v56  ;;  %v611_v51 = vor.u32 1.1754944e-38, %v610_v21 }
 0x2e5   :  { %v1098_v42 = vpop.eup %1097  ;;  %v668_v58 = vand.u32 2147483647, %v1582_v56  ;;  %v670_v7 = vand.u32 2147483648, %v1582_v56  ;;  %v556_v38 = vsub.f32 1.0, %v555_v49  ;;  %1109 = vrcp.f32 %v1633_v19 }
 0x2e6   :  { %v1100_v36 = vpop.eup %1099  ;;  %v600_v13 = vmul.f32 %v1098_v42, %v1568_v39  ;;  %vm605_vm8 = vweird.f32 %v1098_v42 }
 0x2e7   :  { %v615_v15 = vmul.f32 %v1100_v36, %v1571_v31  ;;  %v1638_v4 = vpop.eup %1101  ;;  %vm620_vm13 = vweird.f32 %v1100_v36  ;;  %vm606_vm7 = vmor %vm604_vm9, %vm605_vm8  ;;  %v557_v49 = vmul.f32 %v1592_v59, %v556_v38  ;;  %vm560_vm8 = vweird.f32 %v1592_v59 }
 0x2e8   :  { %v601_v35 = vsub.f32 1.0, %v600_v13  ;;  %v660_v26 = vmul.f32 %v1638_v4, %v1582_v56  ;;  %v1648_v45 = vpop.eup %1103  ;;  %vm621_vm6 = vmor %vm619_vm14, %vm620_vm13  ;;  %vm665_vm9 = vweird.f32 %v1638_v4  ;;  %vm669_vm13 = vcmp.eq.f32.partialorder %v668_v58, 8.507059e+37 }
 0x2e9   :  { %v616_v25 = vsub.f32 1.0, %v615_v15  ;;  %v1106_v50 = vpop.eup %1105  ;;  %v690_v53 = vmul.f32 %v1648_v45, %v1602_v61  ;;  %vm1688_vm14 = vmor %vm664_vm11, %vm665_vm9  ;;  %vm695_vm11 = vweird.f32 %v1648_v45  ;;  %vm559_vm9 = vweird.f32 %v1517_v33 }
 0x2ea   :  { %v602_v30 = vmul.f32 %v1098_v42, %v601_v35  ;;  %v661_v54 = vsub.f32 1.0, %v660_v26  ;;  %v705_v60 = vmul.f32 %v1106_v50, %v1608_v52  ;;  %v1665_v40 = vpop.eup %1107 }
 0x2eb   :  { %731 = vperm.xlu1 %1016, %v523_v34   ;;  %v617_v46 = vmul.f32 %v1100_v36, %v616_v25  ;;  %v691_v0 = vsub.f32 1.0, %v690_v53  ;;  %v715_v34 = vand.u32 2147483648, %v1608_v52  ;;  %v630_v21 = vmul.f32 %v1665_v40, %v1615_v47 }
 0x2ec   :  { %v603_v44 = vadd.f32 %v1098_v42, %v602_v30  ;;  %v662_v28 = vmul.f32 %v1638_v4, %v661_v54  ;;  %v706_v3 = vsub.f32 1.0, %v705_v60  ;;  %v671_v25 = vor.u32 1.1754944e-38, %v670_v7 }
 0x2ed   :  { %v618_v57 = vadd.f32 %v1100_v36, %v617_v46  ;;  %v692_v16 = vmul.f32 %v1648_v45, %v691_v0  ;;  %v631_v29 = vsub.f32 1.0, %v630_v21  ;;  %v454_v53 = vperm.slane %v1486_v24, 7 }
 0x2ee   :  { %v607_v27 = vsel %vm606_vm7, %v1098_v42, %v603_v44  ;;  %v663_v42 = vadd.f32 %v1638_v4, %v662_v28  ;;  %v707_v13 = vmul.f32 %v1106_v50, %v706_v3  ;;  %vm710_vm7 = vweird.f32 %v1106_v50 }
 0x2ef   :  { %v622_v2 = vsel %vm621_vm6, %v1100_v36, %v618_v57  ;;  %v612_v39 = vsel %vm1650_vm10, %v611_v51, %v607_v27  ;;  %v713_v36 = vand.u32 2147483647, %v1608_v52  ;;  %vm1681_vm6 = vmor %vm544_vm15, %vm545_vm12  ;;  %vm709_vm12 = vweird.f32 %v1608_v52 }
 0x2f0   :  { %v627_v8 = vsel %vm1641_vm0, %v626_v55, %v622_v2  ;;  %v613_v31 = vmul.f32 %v1436_v18, %v612_v39  ;;  %v667_v35 = vsel %vm1688_vm14, %v1638_v4, %v663_v42  ;;  %v708_v56 = vadd.f32 %v1106_v50, %v707_v13  ;;  %vm711_vm15 = vmor %vm709_vm12, %vm710_vm7 }
 0x2f1   :  { %v628_v12 = vmul.f32 %v1430_v14, %v627_v8  ;;  %v547_v14 = vsel %vm1681_vm6, %v1526_v63, %v1620_v10  ;;  %v716_v63 = vor.u32 1.1754944e-38, %v715_v34  ;;  %vm549_vm0 = vcmp.eq.f32.partialorder %v548_v5, 8.507059e+37  ;;  %v1110_v5 = vpop.eup %1109  ;;  %vm1725_vm6 = vmor %vm559_vm9, %vm560_vm8 }
 0x2f2   :  { %761 = vperm.xlu2 %1017, %v613_v31   ;;  %v712_v10 = vsel %vm711_vm15, %v1106_v50, %v708_v56  ;;  %vm714_vm10 = vcmp.eq.f32.partialorder %v713_v36, 8.507059e+37  ;;  %v1710_v4 = vperm.slane %v1562_v32, 5  ;;  %v672_v52 = vsel %vm669_vm13, %v671_v25, %v667_v35 }
 0x2f3   :  { %766 = vperm.xlu0 %1015, %v628_v12   ;;  %736 = vperm.xlu1 %1016, %v538_v37   ;;  %v552_v37 = vsel %vm549_vm0, %v1612_v6, %v547_v14  ;;  %v717_v1 = vsel %vm714_vm10, %v716_v63, %v712_v10  ;;  %v558_v55 = vadd.f32 %v1592_v59, %v557_v49  ;;  %v700_v6 = vand.u32 2147483648, %v1602_v61 }
 0x2f4   :  { %v693_v30 = vadd.f32 %v1648_v45, %v692_v16  ;;  %v718_v26 = vmul.f32 %v1448_v23, %v717_v1  ;;  %v553_v46 = vmul.f32 %v1403_v62, %v552_v37  ;;  %v565_v32 = vand.u32 2147483648, %v1517_v33 }
 0x2f5   :  { %v673_v48 = vmul.f32 %v1442_v20, %v672_v52  ;;  %vm694_vm7 = vweird.f32 %v1602_v61  ;;  %v698_v50 = vand.u32 2147483647, %v1602_v61  ;;  %v563_v23 = vand.u32 2147483647, %v1517_v33 }
 0x2f6   :  { %1111 = vrcp.f32 %v1710_v4  ;;  %vm696_vm14 = vmor %vm694_vm7, %vm695_vm11  ;;  %v562_v62 = vsel %vm1725_vm6, %v1592_v59, %v558_v55  ;;  %v632_v61 = vmul.f32 %v1665_v40, %v631_v29  ;;  %v645_v51 = vmul.f32 %v1110_v5, %v1633_v19 }
 0x2f7   :  { %v697_v20 = vsel %vm696_vm14, %v1648_v45, %v693_v30  ;;  %v701_v54 = vor.u32 1.1754944e-38, %v700_v6  ;;  %v566_v33 = vor.u32 1.1754944e-38, %v565_v32  ;;  %vm699_vm12 = vcmp.eq.f32.partialorder %v698_v50, 8.507059e+37 }
 0x2f8   :  { %vm564_vm15 = vcmp.eq.f32.partialorder %v563_v23, 8.507059e+37  ;;  %v633_v7 = vadd.f32 %v1665_v40, %v632_v61  ;;  %vm635_vm0 = vweird.f32 %v1665_v40  ;;  %v646_v59 = vsub.f32 1.0, %v645_v51  ;;  %v1117_v61 = vld [vmem:[%s1824_s0 + $0x50] sm:$0xff] }
 0x2f9   :  { %v702_v57 = vsel %vm699_vm12, %v701_v54, %v697_v20  ;;  %v567_v58 = vsel %vm564_vm15, %v566_v33, %v562_v62  ;;  %v640_v45 = vand.u32 2147483648, %v1615_v47  ;;  %vm634_vm8 = vweird.f32 %v1615_v47  ;;  %v1118_v54 = vld [vmem:[%s1824_s0 + $0x8] sm:$0xff] }
 0x2fa   :  { %796 = vperm.xlu2 %1017, %v718_v26   ;;  %v703_v27 = vmul.f32 %v1451_v9, %v702_v57  ;;  %v568_v28 = vmul.f32 %v1423_v41, %v567_v58  ;;  %v638_v0 = vand.u32 2147483647, %v1615_v47  ;;  %1113 = vrcp.f32 %v454_v53  ;;  %vm636_vm13 = vmor %vm634_vm8, %vm635_vm0 }
 0x2fb   :  { %781 = vperm.xlu0 %1015, %v673_v48   ;;  %741 = vperm.xlu1 %1016, %v553_v46   ;;  %v637_v24 = vsel %vm636_vm13, %v1665_v40, %v633_v7  ;;  %v647_v38 = vmul.f32 %v1110_v5, %v646_v59  ;;  %v641_v39 = vor.u32 1.1754944e-38, %v640_v45  ;;  %vm650_vm11 = vweird.f32 %v1110_v5  ;;  %v1115_v48 = vld [vmem:[%s1824_s0 + $0x48] sm:$0xff]  ;;  %v1119_v7 = vld [vmem:[%s1824_s0] sm:$0xff] }
 0x2fc   :  { %v1112_v60 = vpop.eup %1111  ;;  %vm639_vm10 = vcmp.eq.f32.partialorder %v638_v0, 8.507059e+37  ;;  %v655_v31 = vand.u32 2147483648, %v1633_v19  ;;  %vm649_vm9 = vweird.f32 %v1633_v19  ;;  %v653_v42 = vand.u32 2147483647, %v1633_v19  ;;  %v1122_v0 = vld [vmem:[%s1824_s0 + $0x60] sm:$0xff] }
 0x2fd   :  { %v675_v2 = vmul.f32 %v1112_v60, %v1710_v4  ;;  %v642_v3 = vsel %vm639_vm10, %v641_v39, %v637_v24  ;;  %v648_v8 = vadd.f32 %v1110_v5, %v647_v38  ;;  %vm651_vm7 = vmor %vm649_vm9, %vm650_vm11  ;;  %vm680_vm14 = vweird.f32 %v1112_v60 }
 0x2fe   :  { %v643_v47 = vmul.f32 %v1420_v11, %v642_v3  ;;  %v656_v13 = vor.u32 1.1754944e-38, %v655_v31  ;;  %vm654_vm6 = vcmp.eq.f32.partialorder %v653_v42, 8.507059e+37  ;;  %v685_v14 = vand.u32 2147483648, %v1710_v4  ;;  %v1126_v42 = vld [vmem:[%s1824_s0 + $0x30] sm:$0xff] }
 0x2ff   :  { %v676_v9 = vsub.f32 1.0, %v675_v2  ;;  %v652_v40 = vsel %vm651_vm7, %v1110_v5, %v648_v8  ;;  %vm679_vm12 = vweird.f32 %v1710_v4  ;;  %v683_v11 = vand.u32 2147483647, %v1710_v4  ;;  %v1123_v2 = vld [vmem:[%s1824_s0 + $0x18] sm:$0xff]  ;;  %v1124_v8 = vld [vmem:[%s1824_s0 + $0x20] sm:$0xff] }
 0x300   :  { %v1114_v41 = vpop.eup %1113  ;;  %v657_v36 = vsel %vm654_vm6, %v656_v13, %v652_v40  ;;  %vm681_vm15 = vmor %vm679_vm12, %vm680_vm14  ;;  %v686_v35 = vor.u32 1.1754944e-38, %v685_v14  ;;  %v595_v25 = vand.u32 2147483648, %v454_v53  ;;  %vm589_vm13 = vweird.f32 %v454_v53 }
 0x301   :  { %v677_v34 = vmul.f32 %v1112_v60, %v676_v9  ;;  %v585_v12 = vmul.f32 %v1114_v41, %v454_v53  ;;  %v658_v16 = vmul.f32 %v1445_v22, %v657_v36  ;;  %vm684_vm0 = vcmp.eq.f32.partialorder %v683_v11, 8.507059e+37 }
 0x302   :  { %vm590_vm8 = vweird.f32 %v1114_v41  ;;  %v593_v10 = vand.u32 2147483647, %v454_v53  ;;  %v596_v37 = vor.u32 1.1754944e-38, %v595_v25  ;;  %vm1850_vm9 = vcmask 1046534  }
 0x303   :  { %791 = vperm.xlu0 %1015, %v703_v27   ;;  %746 = vperm.xlu1 %1016, %v568_v28   ;;  %v678_v15 = vadd.f32 %v1112_v60, %v677_v34  ;;  %v586_v18 = vsub.f32 1.0, %v585_v12  ;;  %vm591_vm10 = vmor %vm589_vm13, %vm590_vm8  ;;  %v1121_v27 = vld [vmem:[%s1824_s0 + $0x10] sm:$0xff]  ;;  %v1127_v12 = vld [vmem:[%s1824_s0 + $0x28] sm:$0xff]  ;;  %vm1851_vm7 = vcmask 1047559  }
 0x304   :  { %vm594_vm11 = vcmp.eq.f32.partialorder %v593_v10, 8.507059e+37 }
 0x305   :  { %v682_v19 = vsel %vm681_vm15, %v1112_v60, %v678_v15  ;;  %v587_v49 = vmul.f32 %v1114_v41, %v586_v18  ;;  %v1120_v60 = vld [vmem:[%s1824_s0 + $0x78] sm:$0xff] }
 0x306   :  { %v687_v56 = vsel %vm684_vm0, %v686_v35, %v682_v19 }
 0x307   :  { %v588_v21 = vadd.f32 %v1114_v41, %v587_v49  ;;  %v688_v63 = vmul.f32 %v1433_v17, %v687_v56  ;;  %v1128_v49 = vld [vmem:[%s1824_s0 + $0x58] sm:$0xff] }
 0x309   :  { %v592_v22 = vsel %vm591_vm10, %v1114_v41, %v588_v21  ;;  %v1125_v41 = vld [vmem:[%s1824_s0 + $0x70] sm:$0xff] }
 0x30a   :  { %v597_v4 = vsel %vm594_vm11, %v596_v37, %v592_v22 }
 0x30b   :  { %771 = vperm.xlu1 %1016, %v643_v47   ;;  %v598_v52 = vmul.f32 %v1406_v43, %v597_v4  ;;  %v1116_v43 = vld [vmem:[%s1824_s0 + $0x40] sm:$0xff] }
 0x313   :  { %776 = vperm.xlu1 %1016, %v658_v16  }
 0x31b   :  { %786 = vperm.xlu1 %1016, %v688_v63  }
 0x323   :  { %756 = vperm.xlu1 %1016, %v598_v52  }
 0x339   :  { %v752_v5 = vpop.permute.xlu2 %751 }
 0x33a   :  { %v805_v40 = vmul.f32 %v1126_v42, %v752_v5 }
 0x33c   :  { %v851_v10 = vrot.slane %v805_v40, 4 }
 0x34c   :  { %v762_v6 = vpop.permute.xlu2 %761 }
 0x34d   :  { %v722_v1 = vpop.permute.xlu1 %721  ;;  %v807_v44 = vmul.f32 %v1116_v43, %v762_v6 }
 0x34e   :  { %v799_v59 = vmul.f32 %v1119_v7, %v722_v1 }
 0x34f   :  { %v863_v53 = vrot.slane %v807_v44, 4 }
 0x350   :  { %v815_v36 = vrot.slane %v799_v59, 4 }
 0x351   :  { %v864_v34 = vadd.f32 %v863_v53, %v807_v44 }
 0x352   :  { %v816_v52 = vadd.f32 %v815_v36, %v799_v59 }
 0x353   :  { %v865_v22 = vrot.slane %v864_v34, 2 }
 0x354   :  { %v797_v62 = vpop.permute.xlu2 %796 }
 0x355   :  { %v727_v55 = vpop.permute.xlu1 %726  ;;  %v814_v45 = vmul.f32 %v1120_v60, %v797_v62 }
 0x356   :  { %v800_v33 = vmul.f32 %v1118_v54, %v727_v55 }
 0x357   :  { %v905_v15 = vrot.slane %v814_v45, 4 }
 0x358   :  { %v821_v3 = vrot.slane %v800_v33, 4 }
 0x359   :  { %v906_v1 = vadd.f32 %v905_v15, %v814_v45 }
 0x35a   :  { %v822_v56 = vadd.f32 %v821_v3, %v800_v33 }
 0x35b   :  { %v907_v62 = vrot.slane %v906_v1, 2 }
 0x35d   :  { %v732_v30 = vpop.permute.xlu1 %731 }
 0x35e   :  { %v801_v28 = vmul.f32 %v1121_v27, %v732_v30 }
 0x360   :  { %v827_v18 = vrot.slane %v801_v28, 4 }
 0x362   :  { %v828_v55 = vadd.f32 %v827_v18, %v801_v28 }
 0x365   :  { %v737_v29 = vpop.permute.xlu1 %736  ;;  %v767_v26 = vpop.permute.xlu0 %766 }
 0x366   :  { %v808_v50 = vmul.f32 %v1115_v48, %v767_v26  ;;  %v802_v39 = vmul.f32 %v1123_v2, %v737_v29  ;;  %v852_v48 = vadd.f32 %v851_v10, %v805_v40  ;;  %v908_v2 = vadd.f32 %v907_v62, %v906_v1 }
 0x368   :  { %v869_v20 = vrot.slane %v808_v50, 4  ;;  %v833_v19 = vrot.slane %v802_v39, 4 }
 0x36a   :  { %v870_v38 = vadd.f32 %v869_v20, %v808_v50  ;;  %v834_v5 = vadd.f32 %v833_v19, %v802_v39  ;;  %v866_v50 = vadd.f32 %v865_v22, %v864_v34  ;;  %v829_v20 = vrot.slane %v828_v55, 2 }
 0x36c   :  { %v871_v11 = vrot.slane %v870_v38, 2  ;;  %v835_v33 = vrot.slane %v834_v5, 2  ;;  %v867_v27 = vrot.slane %v866_v50, 1  ;;  %v830_v39 = vadd.f32 %v829_v20, %v828_v55 }
 0x36d   :  { %v742_v46 = vpop.permute.xlu1 %741  ;;  %v782_v32 = vpop.permute.xlu0 %781 }
 0x36e   :  { %v811_v24 = vmul.f32 %v1122_v0, %v782_v32  ;;  %v803_v9 = vmul.f32 %v1124_v8, %v742_v46  ;;  %v872_v29 = vadd.f32 %v871_v11, %v870_v38  ;;  %v823_v46 = vrot.slane %v822_v56, 2 }
 0x36f   :  { %v853_v8 = vrot.slane %v852_v48, 2 }
 0x370   :  { %v887_v14 = vrot.slane %v811_v24, 4  ;;  %v839_v21 = vrot.slane %v803_v9, 4  ;;  %v873_v54 = vrot.slane %v872_v29, 1  ;;  %v824_v7 = vadd.f32 %v823_v46, %v822_v56 }
 0x372   :  { %v888_v30 = vadd.f32 %v887_v14, %v811_v24  ;;  %v840_v6 = vadd.f32 %v839_v21, %v803_v9  ;;  %v874_v9 = vadd.f32 %v873_v54, %v872_v29  ;;  %v909_v14 = vrot.slane %v908_v2, 1  ;;  %v1130_v21 = vld [vmem:[%s1824_s0 + $0x38] sm:$0xff] }
 0x374   :  { %v841_v59 = vrot.slane %v840_v6, 2 }
 0x375   :  { %v747_v17 = vpop.permute.xlu1 %746  ;;  %v792_v57 = vpop.permute.xlu0 %791 }
 0x376   :  { %v813_v31 = vmul.f32 %v1125_v41, %v792_v57  ;;  %v804_v13 = vmul.f32 %v1127_v12, %v747_v17  ;;  %v1129_v57 = vld [vmem:[%s1824_s0 + $0x68] sm:$0xff]  ;;  %v836_v41 = vadd.f32 %v835_v33, %v834_v5  ;;  %v842_v42 = vadd.f32 %v841_v59, %v840_v6  ;;  %s1158_s0 = smov [#allocation2]  }
 0x377   :  { %v868_v12 = vadd.f32 %v867_v27, %v866_v50  ;;  %s949_s24 = sshll.u32 %s1158_s0, 4  ;;  %s950_s24 = int_to_ptr.vmem [resolvable:$true] %s949_s24 }
 0x378   :  { %v899_v25 = vrot.slane %v813_v31, 4  ;;  %v845_v37 = vrot.slane %v804_v13, 4  ;;  %v843_v10 = vrot.slane %v842_v42, 1 }
 0x37a   :  { %v900_v17 = vadd.f32 %v899_v25, %v813_v31  ;;  %v846_v43 = vadd.f32 %v845_v37, %v804_v13  ;;  %v844_v50 = vadd.f32 %v843_v10, %v842_v42 }
 0x37c   :  { %v901_v60 = vrot.slane %v900_v17, 2  ;;  %v847_v28 = vrot.slane %v846_v43, 2 }
 0x37d   :  { %v772_v23 = vpop.permute.xlu1 %771 }
 0x37e   :  { %v809_v51 = vmul.f32 %v1117_v61, %v772_v23  ;;  %v817_v23 = vrot.slane %v816_v52, 2  ;;  %v889_v61 = vrot.slane %v888_v30, 2  ;;  %v902_v40 = vadd.f32 %v901_v60, %v900_v17 }
 0x37f   :  { %v848_v13 = vadd.f32 %v847_v28, %v846_v43 }
 0x380   :  { %v875_v58 = vrot.slane %v809_v51, 4  ;;  %v818_v38 = vadd.f32 %v817_v23, %v816_v52  ;;  %v890_v3 = vadd.f32 %v889_v61, %v888_v30  ;;  %v903_v22 = vrot.slane %v902_v40, 1 }
 0x381   :  { %v854_v30 = vadd.f32 %v853_v8, %v852_v48 }
 0x382   :  { %v876_v47 = vadd.f32 %v875_v58, %v809_v51  ;;  %v819_v18 = vrot.slane %v818_v38, 1  ;;  %v891_v11 = vrot.slane %v890_v3, 1  ;;  %v904_v43 = vadd.f32 %v903_v22, %v902_v40 }
 0x384   :  { %v877_v63 = vrot.slane %v876_v47, 2  ;;  %v892_v5 = vadd.f32 %v891_v11, %v890_v3 }
 0x385   :  { %v777_v16 = vpop.permute.xlu1 %776 }
 0x386   :  { %v810_v35 = vmul.f32 %v1128_v49, %v777_v16  ;;  %v878_v32 = vadd.f32 %v877_v63, %v876_v47  ;;  %v825_v47 = vrot.slane %v824_v7, 1  ;;  %v831_v16 = vrot.slane %v830_v39, 1 }
 0x387   :  { %v934_v49 = vsel %vm231_vm1, %v874_v9, %v868_v12 }
 0x388   :  { %v881_v4 = vrot.slane %v810_v35, 4  ;;  %v879_v45 = vrot.slane %v878_v32, 1  ;;  %v826_v63 = vadd.f32 %v825_v47, %v824_v7  ;;  %v832_v29 = vadd.f32 %v831_v16, %v830_v39 }
 0x38a   :  { %v882_v26 = vadd.f32 %v881_v4, %v810_v35  ;;  %v880_v34 = vadd.f32 %v879_v45, %v878_v32  ;;  %v837_v35 = vrot.slane %v836_v41, 1  ;;  %v849_v4 = vrot.slane %v848_v13, 1 }
 0x38b   :  { %v910_v32 = vadd.f32 %v909_v14, %v908_v2 }
 0x38c   :  { %v883_v44 = vrot.slane %v882_v26, 2  ;;  %v935_v37 = vsel %vm233_vm2, %v880_v34, %v934_v49  ;;  %v838_v46 = vadd.f32 %v837_v35, %v836_v41  ;;  %v850_v62 = vadd.f32 %v849_v4, %v848_v13 }
 0x38d   :  { %v787_v51 = vpop.permute.xlu1 %786 }
 0x38e   :  { %v884_v53 = vadd.f32 %v883_v44, %v882_v26  ;;  %v812_v58 = vmul.f32 %v1129_v57, %v787_v51  ;;  %v820_v26 = vadd.f32 %v819_v18, %v818_v38  ;;  %v855_v51 = vrot.slane %v854_v30, 1 }
 0x390   :  { %v885_v0 = vrot.slane %v884_v53, 1  ;;  %v893_v24 = vrot.slane %v812_v58, 4  ;;  %v927_v23 = vsel %vm231_vm1, %v826_v63, %v820_v26  ;;  %v856_v60 = vadd.f32 %v855_v51, %v854_v30  ;;  %vm1852_vm1 = vmmov %vm1850_vm9 }
 0x391   :  { %v928_v48 = vsel %vm233_vm2, %v832_v29, %v927_v23  ;;  %vm1853_vm2 = vmmov %vm1851_vm7 }
 0x392   :  { %v894_v31 = vadd.f32 %v893_v24, %v812_v58  ;;  %v886_v36 = vadd.f32 %v885_v0, %v884_v53  ;;  %v929_v33 = vsel %vm235_vm3, %v838_v46, %v928_v48 }
 0x393   :  { %v930_v58 = vsel %vm237_vm4, %v844_v50, %v929_v33 }
 0x394   :  { %v895_v15 = vrot.slane %v894_v31, 2  ;;  %v936_v52 = vsel %vm235_vm3, %v886_v36, %v935_v37  ;;  %v931_v7 = vsel %vm239_vm5, %v850_v62, %v930_v58 }
 0x395   :  { %v757_v19 = vpop.permute.xlu1 %756  ;;  %v937_v44 = vsel %vm237_vm4, %v892_v5, %v936_v52  ;;  %v932_v27 = vsel %vm1852_vm1, %v856_v60, %v931_v7 }
 0x396   :  { %v896_v56 = vadd.f32 %v895_v15, %v894_v31  ;;  %v806_v25 = vmul.f32 %v1130_v21, %v757_v19 }
 0x398   :  { %v897_v1 = vrot.slane %v896_v56, 1  ;;  %v857_v55 = vrot.slane %v806_v25, 4 }
 0x39a   :  { %v898_v6 = vadd.f32 %v897_v1, %v896_v56  ;;  %v858_v17 = vadd.f32 %v857_v55, %v806_v25 }
 0x39c   :  { %v938_v20 = vsel %vm239_vm5, %v898_v6, %v937_v44  ;;  %v859_v61 = vrot.slane %v858_v17, 2 }
 0x39d   :  { %v939_v54 = vsel %vm1850_vm9, %v904_v43, %v938_v20 }
 0x39e   :  { %v860_v53 = vadd.f32 %v859_v61, %v858_v17  ;;  %v940_v57 = vsel %vm1851_vm7, %v910_v32, %v939_v54 }
 0x39f   :  { %944 = vst [vmem:[#allocation2 + $0x8] sm:$0xff] %v940_v57 }
 0x3a0   :  { %v861_v59 = vrot.slane %v860_v53, 1 }
 0x3a2   :  { %v862_v45 = vadd.f32 %v861_v59, %v860_v53 }
 0x3a4   :  { %v933_v28 = vsel %vm1853_vm2, %v862_v45, %v932_v27 }
 0x3a5   :  { %943 = vst [vmem:[#allocation2] sm:$0xff] %v933_v28 }
 0x3a6   :  { %957 = dma.vmem_to_hbm [thread:$0]  %s950_s24, 256, %s952_s27, [#allocation3], %s1159_s28, %s1159_s28, %s1160_s29  }
 0x3a7   :  { %1155 = dma.done.wait [#allocation3], 256  }
 0x3a8   :  { %1156 = vsyncadd [#allocation3], 4294967040 }
 0x3a9   :  { %962 = vsyncpa [#allocation3], 1 }

</bundles_post_ra>
